<compile_context>
chip_gen: v6e
topology: v6e:2x2x1
jax: 0.10.0
libtpu: 0.0.40
codegen_flags: <defaults>
</compile_context>

<pallas_src>
import functools

import jax
import jax.numpy as jnp
from jax import lax
from jax.experimental import pallas as pl
from jax.experimental.pallas import tpu as pltpu


def _jsd_kernel(p_ref, q_ref, o_ref, *, valid_rows_last, ragged):
    def partial_sum(pp, qq):
        pp = pp.astype(jnp.float32)
        qq = qq.astype(jnp.float32)
        m = 0.5 * (pp + qq)
        inv_m = pl.reciprocal(m, approx=False)           # exact 1/m (EUP + Newton)
        # p*(log p - log m) + q*(log q - log m) with only 2 logs + 1 reciprocal.
        term = pp * jnp.log(pp * inv_m) + qq * jnp.log(qq * inv_m)
        return jnp.full(o_ref.shape, jnp.sum(term), jnp.float32)

    p = p_ref[...]
    q = q_ref[...]

    if not ragged:
        o_ref[...] = partial_sum(p, q)
    else:
        is_last = pl.program_id(0) == pl.num_programs(0) - 1

        @pl.when(jnp.logical_not(is_last))
        def _():
            o_ref[...] = partial_sum(p, q)

        @pl.when(is_last)
        def _():
            # Rows >= valid_rows_last in the last block are out-of-bounds
            # garbage; p = q = 1 makes their contribution exactly 0.
            row = lax.broadcasted_iota(jnp.int32, (p.shape[0], 1), 0)
            keep = row < valid_rows_last
            pm = jnp.where(keep, p, jnp.ones_like(p))
            qm = jnp.where(keep, q, jnp.ones_like(q))
            o_ref[...] = partial_sum(pm, qm)


def _choose_block_rows(n_rows, n_cols, itemsize):
    """Row-block size targeting ~2 MiB of lane-padded f32 VMEM per input block."""
    gran = max(8, 32 // itemsize)                 # sublane granule: f32 8, bf16 16, int8 32
    cols_padded = ((n_cols + 127) // 128) * 128   # VMEM lane padding
    target_bytes = 2 * 1024 * 1024
    rows = (target_bytes // (cols_padded * 4)) // gran * gran
    rows = max(gran, rows)
    if rows >= n_rows:
        if n_rows >= 2 * gran:
            # Split into >=2 balanced blocks so the "parallel" grid axis can
            # feed both TensorCores on v7x.
            half = (n_rows + 1) // 2
            rows = ((half + gran - 1) // gran) * gran
        else:
            rows = n_rows        # full second-to-last dim: always legal
    return rows


def jsd(p, q):
    """Pallas TPU implementation of JSD.forward (returns a scalar f32)."""
    if p.shape != q.shape:
        raise ValueError(
            "p and q must have the same shape, got {} and {}".format(p.shape, q.shape))

    d_last = p.shape[-1]
    batch_rows = p.size // d_last          # 'batchmean' denominator B
    n = p.size

    # Lane-dense 2-D view (R, C) with C a multiple of 128 when possible
    # (the global sum is invariant under any reshape of the flat data).
    C = next((c for c in (512, 256, 128) if n % c == 0), None)
    if C is None:
        # TODO(synk): element counts that are not a multiple of 128 fall back to
        # the natural (-1, last_dim) view; a huge *odd* last dim could exceed the
        # VMEM budget here (would need a column grid axis), but that is rare.
        C = d_last
    R = n // C
    p2 = p.reshape(R, C)
    q2 = q.reshape(R, C)

    itemsize = max(jnp.dtype(p.dtype).itemsize, jnp.dtype(q.dtype).itemsize)
    block_rows = _choose_block_rows(R, C, itemsize)
    nb = pl.cdiv(R, block_rows)
    ragged = (R % block_rows) != 0
    valid_rows_last = R - (nb - 1) * block_rows

    in_spec = pl.BlockSpec((block_rows, C), lambda i: (i, 0))
    out_spec = pl.BlockSpec((1, 8, 128), lambda i: (i, 0, 0))

    partials = pl.pallas_call(
        functools.partial(_jsd_kernel,
                          valid_rows_last=valid_rows_last,
                          ragged=ragged),
        out_shape=jax.ShapeDtypeStruct((nb, 8, 128), jnp.float32),
        grid=(nb,),
        in_specs=[in_spec, in_spec],
        out_specs=out_spec,
        compiler_params=pltpu.CompilerParams(
            dimension_semantics=("parallel",),
            vmem_limit_bytes=32 * 1024 * 1024),
    )(p2, q2)

    total = jnp.sum(partials[:, 0, 0])
    return 0.5 * total / jnp.float32(batch_rows)


def jsd_ref(p, q):
    """Pure-JAX reference mirroring the PyTorch module."""
    d = p.shape[-1]
    p2 = p.reshape(-1, d).astype(jnp.float32)
    q2 = q.reshape(-1, d).astype(jnp.float32)
    m_log = jnp.log(0.5 * (p2 + q2))

    def kl(input_log, target_log):
        # nn.KLDivLoss(reduction='batchmean', log_target=True)
        return jnp.sum(jnp.exp(target_log) * (target_log - input_log)) / p2.shape[0]

    return 0.5 * (kl(m_log, jnp.log(p2)) + kl(m_log, jnp.log(q2)))


if __name__ == "__main__":
    key = jax.random.PRNGKey(0)
    k1, k2, k3, k4, k5, k6 = jax.random.split(key, 6)

    # Primary case consistent with the module: (batch=2, seq=8, classes=32),
    # viewed as (-1, 32).  Probability distributions over the last axis.
    shape = (2, 8, 32)
    p = jax.nn.softmax(jax.random.normal(k1, shape, dtype=jnp.float32), axis=-1)
    q = jax.nn.softmax(jax.random.normal(k2, shape, dtype=jnp.float32), axis=-1)
    out = jax.block_until_ready(jsd(p, q))
    ref = jsd_ref(p, q)
    assert out.shape == ref.shape == ()
    assert jnp.allclose(out, ref, atol=1e-5, rtol=1e-5), (out, ref)

    # Exercise the lane-padded fallback path with a ragged last block.
    p2 = jax.nn.softmax(jax.random.normal(k3, (20, 40), dtype=jnp.float32), axis=-1)
    q2 = jax.nn.softmax(jax.random.normal(k4, (20, 40), dtype=jnp.float32), axis=-1)
    out2 = jax.block_until_ready(jsd(p2, q2))
    assert jnp.allclose(out2, jsd_ref(p2, q2), atol=1e-5, rtol=1e-5)

    # Exercise the lane-dense flat path with >1 grid step and a ragged last block.
    p3 = jax.nn.softmax(jax.random.normal(k5, (2, 100, 64), dtype=jnp.float32), axis=-1)
    q3 = jax.nn.softmax(jax.random.normal(k6, (2, 100, 64), dtype=jnp.float32), axis=-1)
    out3 = jax.block_until_ready(jsd(p3, q3))
    assert jnp.allclose(out3, jsd_ref(p3, q3), atol=1e-5, rtol=1e-5)

    print("KERNEL_OK")
</pallas_src>

<mosaic_0001>
module attributes {stable_mosaic.version = 11 : i64} {
  func.func @_jsd_kernel(%arg0: i32, %arg1: memref<1x512xf32, #tpu.memory_space<vmem>>, %arg2: memref<1x512xf32, #tpu.memory_space<vmem>>, %arg3: memref<1x8x128xf32, #tpu.memory_space<vmem>>) attributes {dimension_semantics = [#tpu.dimension_semantics<parallel>], iteration_bounds = array<i64: 1>, scalar_prefetch = 0 : i64, scratch_operands = 0 : i64, tpu.core_type = #tpu.core_type<tc>, window_params = [{transform_indices = @transform_0, window_bounds = array<i64: 1, 512>}, {transform_indices = @transform_1, window_bounds = array<i64: 1, 512>}, {transform_indices = @transform_2, window_bounds = array<i64: 1, 8, 128>}]} {
    %c0 = arith.constant 0 : index
    %c0_0 = arith.constant 0 : index
    %0 = vector.load %arg1[%c0, %c0_0] : memref<1x512xf32, #tpu.memory_space<vmem>>, vector<1x512xf32>
    %c0_1 = arith.constant 0 : index
    %c0_2 = arith.constant 0 : index
    %1 = vector.load %arg2[%c0_1, %c0_2] : memref<1x512xf32, #tpu.memory_space<vmem>>, vector<1x512xf32>
    %2 = arith.addf %0, %1 : vector<1x512xf32>
    %cst = arith.constant 5.000000e-01 : f32
    %3 = vector.broadcast %cst : f32 to vector<1x512xf32>
    %4 = arith.mulf %3, %2 : vector<1x512xf32>
    %5 = tpu.reciprocal %4 : vector<1x512xf32> -> vector<1x512xf32>
    %6 = arith.mulf %0, %5 : vector<1x512xf32>
    %7 = math.log %6 : vector<1x512xf32>
    %8 = arith.mulf %0, %7 : vector<1x512xf32>
    %9 = arith.mulf %1, %5 : vector<1x512xf32>
    %10 = math.log %9 : vector<1x512xf32>
    %11 = arith.mulf %1, %10 : vector<1x512xf32>
    %12 = arith.addf %8, %11 : vector<1x512xf32>
    %13 = vector.shape_cast %12 : vector<1x512xf32> to vector<1x1x512xf32>
    %cst_3 = arith.constant dense<0.000000e+00> : vector<1xf32>
    %14 = vector.multi_reduction <add>, %13, %cst_3 [1, 2] : vector<1x1x512xf32> to vector<1xf32>
    %15 = vector.shape_cast %14 : vector<1xf32> to vector<1x1x1xf32>
    %16 = vector.extract %15[0, 0, 0] : f32 from vector<1x1x1xf32>
    %17 = vector.broadcast %16 : f32 to vector<1x8x128xf32>
    %c0_4 = arith.constant 0 : index
    %c0_5 = arith.constant 0 : index
    %c0_6 = arith.constant 0 : index
    %18 = vector.load %arg3[%c0_4, %c0_5, %c0_6] : memref<1x8x128xf32, #tpu.memory_space<vmem>>, vector<1x8x128xf32>
    tpu.vector_store %arg3[%c0_4, %c0_5, %c0_6], %17 {strides = array<i32>} : memref<1x8x128xf32, #tpu.memory_space<vmem>>, vector<1x8x128xf32>,
    return
  }
  func.func @transform_0(%arg0: i32) -> (i32, i32) {
    %c0_i32 = arith.constant 0 : i32
    %c0_i32_0 = arith.constant 0 : i32
    return %arg0, %c0_i32 : i32, i32
  }
  func.func @transform_1(%arg0: i32) -> (i32, i32) {
    %c0_i32 = arith.constant 0 : i32
    %c0_i32_0 = arith.constant 0 : i32
    return %arg0, %c0_i32 : i32, i32
  }
  func.func @transform_2(%arg0: i32) -> (i32, i32, i32) {
    %c0_i32 = arith.constant 0 : i32
    %c0_i32_0 = arith.constant 0 : i32
    %c0_i32_1 = arith.constant 0 : i32
    return %arg0, %c0_i32, %c0_i32_0 : i32, i32, i32
  }
}

</mosaic_0001>

<bundles_post_ra>
// kernel: tpu_custom_call.1
= control target key start
LH: loop header
LB: loop body
LE: loop exit
PB: predicated region body
PF: predicated region fallthrough
CT: control target
= control target key end

     0   :  { %7 = vsyncpa [#allocation3], 0  ;;  %s210_s0 = inlined_call_operand.hbm [shape: f32[1,512], index: 0, kind: input, shape index: {}]   ;;  %s211_s1 = inlined_call_operand.hbm [shape: f32[1,512], index: 1, kind: input, shape index: {}]   ;;  %s212_s2 = inlined_call_operand.hbm [shape: f32[1,8,128], index: 2, kind: output, shape index: {}]  }
   0x1   :  { %8 = vsyncpa [#allocation6], 0 }
   0x2   :  { %9 = vsyncpa [#allocation4], 0  ;;  %s183_s9 = smov [#allocation2]   ;;  %s184_s11 = smov [#allocation5]  }
   0x3   :  { %s16_s10 = sshll.u32 %s183_s9, 4  ;;  %s26_s12 = sshll.u32 %s184_s11, 4  ;;  %s17_s10 = int_to_ptr.vmem [resolvable:$true] %s16_s10  ;;  %s27_s12 = int_to_ptr.vmem [resolvable:$true] %s26_s12 }
   0x4   :  { %s125_s13 = scalar_lea.vmem %s17_s10, 64  ;;  %p130_p1 = scmp.lt.s32.totalorder %s17_s10, %s17_s10 }
   0x5   :  { %p126_p0 = scmp.ne.s32.totalorder %s17_s10, %s125_s13  ;;  %p131_p2 = scmp.lt.s32.totalorder %s125_s13, %s125_s13 }
   0x7   :  { %p132_p3 = por %p131_p2, %p130_p1 }
   0x9   :  { %p133_p4 = pnand %p132_p3, %p126_p0 }
   0xb   :  { %136 = shalt.err (!%p133_p4)
}
   0xc   :  { %19 = dma.hbm_to_vmem [thread:$0]  %s210_s0, 64, %s17_s10, [#allocation3]  }
   0xd   :  { %s145_s16 = scalar_lea.vmem %s27_s12, 64  ;;  %p150_p6 = scmp.lt.s32.totalorder %s27_s12, %s27_s12 }
   0xe   :  { %p146_p5 = scmp.ne.s32.totalorder %s27_s12, %s145_s16  ;;  %p151_p7 = scmp.lt.s32.totalorder %s145_s16, %s145_s16 }
  0x10   :  { %p152_p8 = por %p151_p7, %p150_p6 }
  0x12   :  { %p153_p9 = pnand %p152_p8, %p146_p5 }
  0x14   :  { %156 = shalt.err (!%p153_p9)
}
  0x15   :  { %29 = dma.hbm_to_vmem [thread:$0]  %s211_s1, 64, %s27_s12, [#allocation6]  }
  0x16   :  { %177 = dma.done.wait [#allocation3], 64  }
  0x17   :  { %178 = vsyncadd [#allocation3], 4294967232 }
  0x18   :  { %179 = dma.done.wait [#allocation6], 64  }
  0x19   :  { %180 = vsyncadd [#allocation6], 4294967232  ;;  %v36_v0 = vld [vmem:[#allocation2] sm:$0xf]  ;;  %v37_v1 = vld [vmem:[#allocation5] sm:$0xf]  ;;  %v51_v7 = vlaneseq }
  0x1a   :  { %v38_v2 = vadd.f32 %v37_v1, %v36_v0  ;;  %vm71_vm0 = vcmask 1040384   ;;  %s185_s0 = smov [#allocation7]  }
  0x1b   :  { %v52_v8 = vshrl.u32 %v51_v7, 7  ;;  %s96_s1 = sshll.u32 %s185_s0, 4  ;;  %s97_s1 = int_to_ptr.vmem [resolvable:$true] %s96_s1 }
  0x1c   :  { %v39_v3 = vmul.f32 0.5, %v38_v2  ;;  %s157_s20 = scalar_lea.vmem %s97_s1, 128  ;;  %p162_p11 = scmp.lt.s32.totalorder %s97_s1, %s97_s1 }
  0x1d   :  { %v53_v14 = vsub.s32 0, %v52_v8  ;;  %v57_v16 = vsub.s32 1, %v52_v8  ;;  %v61_v17 = vsub.s32 2, %v52_v8  ;;  %v65_v18 = vsub.s32 3, %v52_v8  ;;  %p158_p10 = scmp.ne.s32.totalorder %s97_s1, %s157_s20  ;;  %p163_p12 = scmp.lt.s32.totalorder %s157_s20, %s157_s20 }
  0x1e   :  { %111 = vrcp.f32 %v39_v3 }
  0x1f   :  { %p164_p13 = por %p163_p12, %p162_p11 }
  0x21   :  { %p165_p0 = pnand %p164_p13, %p158_p10 }
  0x2b   :  { %v112_v4 = vpop.eup %111 }
  0x2c   :  { %v41_v5 = vmul.f32 %v112_v4, %v36_v0  ;;  %v45_v6 = vmul.f32 %v112_v4, %v37_v1 }
  0x2e   :  { %113 = vlog2.f32 %v41_v5 }
  0x2f   :  { %115 = vlog2.f32 %v45_v6 }
  0x3b   :  { %v114_v9 = vpop.eup %113 }
  0x3c   :  { %v116_v10 = vpop.eup %115  ;;  %v43_v11 = vmul.f32 0.6931472, %v114_v9 }
  0x3d   :  { %v47_v12 = vmul.f32 0.6931472, %v116_v10 }
  0x3e   :  { %v44_v13 = vmul.f32 %v43_v11, %v36_v0 }
  0x3f   :  { %v48_v15 = vmul.f32 %v47_v12, %v37_v1 }
  0x41   :  { %v49_v19 = vadd.f32 %v48_v15, %v44_v13 }
  0x43   :  { %v54_v20 = vrot.slane %v49_v19, %v53_v14  ;;  %v58_v21 = vrot.slane %v49_v19, %v57_v16  ;;  %v62_v22 = vrot.slane %v49_v19, %v61_v17  ;;  %v66_v23 = vrot.slane %v49_v19, %v65_v18 }
  0x45   :  { %v72_v24 = vsel %vm71_vm0, %v54_v20, 0.0  ;;  %v73_v25 = vsel %vm71_vm0, %v58_v21, 0.0  ;;  %v75_v26 = vsel %vm71_vm0, %v62_v22, 0.0  ;;  %v77_v28 = vsel %vm71_vm0, %v66_v23, 0.0 }
  0x46   :  { %v74_v27 = vadd.f32 %v73_v25, %v72_v24 }
  0x48   :  { %v76_v29 = vadd.f32 %v75_v26, %v74_v27 }
  0x4a   :  { %v78_v30 = vadd.f32 %v77_v28, %v76_v29 }
  0x4c   :  { %79 = vadd.xlane.f32.xlu0 %v78_v30 }
  0xd5   :  { %v80_v31 = vpop.xlane.xlu0 %79 }
  0xd6   :  { %v81_v32 = vrot.slane %v80_v31, 4 }
  0xd8   :  { %v82_v33 = vadd.f32 %v81_v32, %v80_v31 }
  0xda   :  { %v83_v34 = vrot.slane %v82_v33, 2 }
  0xdc   :  { %v84_v35 = vadd.f32 %v83_v34, %v82_v33 }
  0xde   :  { %v85_v36 = vrot.slane %v84_v35, 1 }
  0xe0   :  { %v86_v37 = vadd.f32 %v85_v36, %v84_v35 }
  0xe2   :  { %106 = vpush %v86_v37 }
 0x113   :  { %s107_s19 = spop %106 }
 0x114   :  { %v88_v38 = vstv %s107_s19 }
 0x115   :  { %89 = vst [vmem:[#allocation7] sm:$0xff] %v88_v38 }
 0x116   :  { %168 = shalt.err (!%p165_p0)
}
 0x117   :  { %99 = dma.vmem_to_hbm [thread:$0]  %s97_s1, 128, %s212_s2, [#allocation4]  }
 0x118   :  { %181 = dma.done.wait [#allocation4], 128  }
 0x119   :  { %182 = vsyncadd [#allocation4], 4294967168 }
 0x11a   :  { %103 = vsyncpa [#allocation3], 1 }
 0x11b   :  { %104 = vsyncpa [#allocation6], 1 }
 0x11c   :  { %105 = vsyncpa [#allocation4], 1 }

</bundles_post_ra>
